<compile_context>
chip_gen: v6e
topology: v6e:2x2x1
jax: 0.10.0
libtpu: 0.0.40
codegen_flags: <defaults>
</compile_context>

<pallas_src>
import numpy as np
import jax
import jax.numpy as jnp
from jax.experimental import pallas as pl
from jax.experimental.pallas import tpu as pltpu

q_clusters_15subjects = [
    30, 33, 12, 19, 7, 7, 13, 35, 2, 18, 34, 13, 5, 16, 6, 2, 31, 9, 25, 35,
    32, 7, 2, 9, 22, 21, 30, 10, 5, 7, 9, 16, 12, 8, 2, 6, 23, 6, 12, 9,
    25, 20, 22, 35, 12, 15, 27, 2, 28, 16, 8, 27, 12, 10, 13, 4, 8, 9, 15, 28,
    23, 11, 1, 20, 12, 18, 1, 12, 18, 3, 19, 3, 33, 21, 7, 7, 11, 3, 9, 28,
    5, 8, 34, 16, 27, 19, 2, 7, 34, 15, 8, 1, 26, 14, 11, 12, 12, 13, 15, 12,
    30, 17, 13, 30, 7, 7, 3, 2, 2, 34, 27, 24, 7, 1, 33, 3, 0, 28, 9, 13,
    19, 5, 32, 30, 14, 24, 13, 16, 6, 12, 7, 12, 6, 35, 1, 25, 27, 1, 14, 3,
    22, 2, 13, 27, 2, 17, 13, 33, 33, 8, 34, 2, 19, 12, 19, 20, 10, 4, 7, 1,
    13, 13, 15, 8, 5, 0, 0, 1, 6, 21, 12, 15, 2, 8, 10, 2, 20, 18, 11, 21,
    24, 18, 21, 13, 15, 8, 35, 35, 1, 2, 9, 27, 35, 12, 9, 25, 34, 7, 12, 3,
    5, 3, 2, 13, 27, 12, 5, 29, 7, 24, 7, 9, 1, 9, 16, 0, 23, 22, 19, 3,
    9, 8, 3, 20, 9, 20, 12, 12, 30, 22, 2, 18, 9, 13, 0, 21, 15, 4, 3, 15,
    27, 22, 23, 1, 2, 22, 3, 22, 9, 28, 17, 5, 9, 9, 27, 22, 19, 12, 1, 32,
    18, 12, 23, 4, 10, 31, 13, 3, 16, 13, 19, 6, 27, 27, 25, 8, 15, 9, 12, 3,
    6, 19, 33, 7, 7, 7, 34, 7, 3, 16, 25, 32, 24, 34, 28, 0, 34, 12, 3, 21,
    6, 24, 7, 7, 3, 7, 12, 4, 17, 8, 5, 8, 7, 17, 24, 23, 25, 12, 2, 35,
    12, 31, 20, 28, 5, 1, 25, 13, 16, 1, 29, 1, 17, 16, 27, 2, 8, 12, 12, 35,
    3, 7, 27, 16, 13, 24, 3, 12, 2, 4, 3, 0, 21, 4, 2, 33, 27, 2, 16, 13,
    11, 7, 12, 20, 2, 22, 12, 0, 16, 12, 1, 28, 12, 15, 2, 18, 1, 23, 21, 15,
    18, 11, 11, 11, 28, 33, 0, 13, 32, 8, 1, 21, 27, 0, 4, 5, 17, 7, 13, 19,
    9, 0, 13, 2, 28, 2, 16, 14, 30, 6, 15, 12, 19, 16, 9, 13, 20, 9, 1, 32,
    5, 7, 2, 1, 35, 12, 28, 24, 16, 32, 35, 21, 5, 20, 1, 23, 8, 15, 8, 30,
    19, 31, 16, 35, 3, 16, 4, 15, 11, 3, 16, 3, 9, 7, 1, 0, 27, 23, 5, 3,
    7, 8, 14, 19, 2, 32, 29, 27, 12, 2, 8, 9, 26, 13, 23, 12, 10, 2, 5, 22,
    20, 31, 24, 9, 25, 28, 33, 29, 18, 0, 7, 12, 29, 18, 6, 8, 1, 12, 16, 30,
    1, 23, 8, 12, 7, 21, 19, 12, 35, 12, 8, 30, 15, 32, 20, 15, 2, 6, 1, 0,
    7, 7, 28, 22, 13, 29, 0, 15, 12, 19, 25, 24, 22, 19, 8, 12, 16, 25, 9, 1,
    7, 5, 22, 5, 5, 23, 5, 8, 13, 27, 13, 26, 6, 5, 12, 20, 16, 22, 11, 16,
    8, 12, 15, 1, 6, 30, 2, 27, 1, 34, 6, 1, 28, 21, 11, 23, 27, 1, 12, 8,
    10, 2, 12, 16, 12, 5, 20, 12, 34, 15, 7, 26, 1, 13, 13, 13, 27, 30, 5, 7,
    27, 9, 9, 8, 6, 29, 5, 8, 28, 15, 23, 30, 9, 27, 25, 8, 15, 2, 27, 5,
    23, 19, 2, 31, 19, 12, 5, 11, 5, 5, 19, 11, 15, 2, 13, 9, 28, 12, 1, 12,
    0, 13, 12, 0, 32, 9, 21, 9, 19, 17, 15, 35, 13, 18, 13, 12, 4, 31, 23, 7,
    21, 5, 1, 2, 34, 13, 1, 10, 1, 12, 0, 1, 21, 9, 16, 33, 8, 18, 0, 18,
    23, 6, 14, 34, 21, 5, 6, 9, 1, 16, 20, 24, 19, 31, 12, 9, 2, 24, 30, 11,
    5, 12, 33, 0, 11, 18, 4, 28, 15, 27, 30, 19, 16, 9, 14, 27, 12, 18, 29, 5,
    8, 24, 0, 21, 6, 31, 21, 5, 5, 13, 0, 12, 10, 5, 7, 2, 11, 13, 21, 12,
    1, 20, 18, 6, 1, 18, 27, 5, 22, 7, 9, 35, 32, 13, 5, 12, 30, 7, 10, 7,
    20, 14, 19, 3, 15, 16, 12, 13, 30, 19, 18, 2, 7, 2, 23, 16, 22, 26, 29, 13,
    28, 15, 8, 12, 7, 28, 27, 16, 29, 34, 19, 5, 21, 13, 2, 27, 12, 7, 33, 16,
    3, 0, 18, 9, 23, 12, 24, 17, 21, 1, 8, 18, 2, 7, 0, 4, 30, 21, 1, 6,
    16, 0, 6, 13, 31, 12, 7, 15, 11, 17, 5, 8, 1, 7, 11, 31, 20, 16, 6, 7,
    20, 20, 7, 7, 12, 13, 5, 12, 2, 15, 31, 28, 27, 6, 13, 0, 1, 11, 20, 22,
    8, 6, 1, 32, 7, 12, 16, 13, 5, 34, 35, 22, 12, 2, 19, 6, 1, 16, 3, 10,
    28, 32, 23, 7, 6, 11, 13, 32, 4, 25, 22, 27, 1, 5, 17, 2, 27, 6, 12, 3,
    15, 13, 12, 5, 30, 5, 8, 8, 21, 1, 8, 2, 15, 25, 25, 7, 0, 20, 12, 27,
    22, 23, 1, 13, 5, 27, 12, 19, 10, 5, 35, 27, 10, 20, 17, 25, 18, 32, 15, 7,
    8, 16, 15, 13, 2, 6, 0, 19, 8, 7, 9, 21, 2, 23, 7, 7, 13, 18, 30, 35,
    12, 35, 0, 3, 17, 3, 12, 19, 0, 30, 15, 30, 7, 15, 13, 1, 29, 29, 22, 19,
    32, 2, 29, 1, 1, 20, 34, 2, 1, 23, 4, 11, 5, 30, 12, 19, 7, 18, 1, 8,
    13, 0, 28, 17, 11, 9, 19, 13, 5, 30, 22, 7, 10, 13, 11, 30, 2, 6, 2, 0,
    7, 23, 19, 2, 18, 5, 9, 8, 22, 12, 22, 13, 2, 12, 20, 9, 6, 30, 13, 12,
    29, 30, 1, 8, 4, 35, 16, 11, 6, 3, 30, 9, 17, 5, 24, 18, 28, 8, 23, 23,
    7, 27, 0, 18, 27, 16, 30, 28, 12, 15, 8, 21, 1, 11, 2, 5, 19, 5, 12, 23,
    26, 14, 27, 30, 30, 19, 6, 21, 5, 23, 15, 7, 12, 24, 29, 3, 7, 18, 11, 30,
    19, 5, 4, 12, 12, 22, 13, 23, 20, 13, 2, 3, 8, 18, 12, 25, 35, 28, 4, 31,
    7, 17, 6, 28, 8, 7, 11, 3, 5, 0, 19, 30, 7, 12, 28, 16, 7, 8, 5, 25,
    24, 15, 19, 2, 5, 35, 7, 29, 33, 27, 25, 22, 11, 24, 20, 16, 6, 0, 27, 4,
    19, 11, 32, 11, 7, 22, 11, 12, 32, 2, 1, 17, 20, 24, 31, 5, 13, 14, 7, 19,
    23, 3, 33, 10, 20, 2, 23, 8, 0, 2, 7, 33, 3, 7, 23, 21, 16, 13, 22, 23,
    30, 0, 17, 33, 12, 12, 13, 2, 23, 7, 7, 8, 7, 22, 12, 6, 14, 22, 4, 8,
    6, 27, 0, 27, 5, 24, 13, 0, 1, 12, 7, 5, 2, 24, 6, 5, 23, 1, 5, 17,
    16, 33, 5, 21, 10, 7, 5, 8, 16, 5, 34, 6, 28, 27, 2, 7, 2, 27, 21, 27,
    7, 35, 7, 33, 0, 7, 23, 7, 27, 23, 9, 10, 1, 1, 26, 21, 3, 19, 17, 1,
    14, 14, 23, 11, 13, 18, 5, 17, 24, 25, 7, 2, 13, 25, 9, 14, 27, 2, 30, 6,
    2, 31, 27, 17, 8, 12, 3, 0, 1, 9, 12, 5, 6, 8, 21, 21, 7, 13, 17, 3,
    21, 12, 12, 22, 28, 21, 12, 5, 9, 0, 12, 30, 15, 3, 7, 8, 16, 2, 23, 15,
    31, 3, 16, 28, 12, 14, 11, 7, 21, 15, 30, 24, 35, 6, 17, 5, 29, 2, 13, 1,
    12, 6, 19, 13, 13, 30, 13, 12, 28, 16, 1, 24, 28, 16, 3, 22, 19, 35, 12, 30,
    1, 20, 35, 13, 15, 15, 21, 14, 16, 21, 24, 9, 12, 13, 27, 5, 1, 7, 35, 13,
    12, 8, 7, 18, 11, 15, 35, 2, 23, 8, 18, 9, 6, 12, 15, 16, 26, 24, 19, 32,
    27, 23, 12, 15, 19, 8, 16, 12, 5, 9, 10, 27, 3, 27, 12, 1, 2, 2, 15, 34,
    17, 2, 13, 13, 5, 30, 27, 3, 19, 3, 13, 27, 12, 25, 15, 19, 12, 11, 0, 18,
    7, 8, 15, 9, 13, 13, 19, 12, 11, 23, 5, 12, 8, 12, 12, 12, 30, 6, 2, 28,
    33, 4, 12, 12, 32, 3, 17, 11, 10, 12, 12, 28, 20, 12, 13, 23, 15, 19, 23, 15,
    29, 27, 23, 5, 13, 28, 3, 9, 27, 26, 20, 24, 32, 30, 21, 15, 34, 23, 0, 7,
    5, 2, 13, 1, 13, 30, 2, 8, 22, 30, 13, 5, 9, 17, 35, 1, 1, 21, 12, 12,
    0, 13, 12, 7, 0, 14, 34, 19, 13, 6, 15, 14, 13, 7, 4, 19, 13, 21, 28, 15,
    12, 9, 22, 4, 23, 2, 22, 2, 21, 20, 23, 27, 28, 19, 30, 12, 8, 3, 27, 32,
    0, 5, 28, 19, 18, 7, 12, 13, 20, 12, 27, 24, 2, 3, 3, 9, 32, 1, 2, 22,
    9, 31, 16, 2, 9, 28, 22, 20, 9, 29, 9, 2, 1, 13, 1, 7, 1, 28, 20, 24,
    13, 20, 30, 10, 11, 27, 2, 34, 22, 13, 34, 13, 33, 5, 22, 15, 17, 9, 13, 19,
    28, 16, 1, 12, 23, 0, 9, 31, 9, 9, 8, 21, 30, 10, 31, 33, 5, 9, 5, 20,
    31, 13, 32, 32, 13, 6, 0, 9, 35, 1, 15, 12, 20, 12, 21, 12, 2, 7, 23, 6,
    15, 25, 3, 24, 22, 9, 28, 7, 18, 29, 13, 1, 7, 5, 35, 7, 22, 19, 0, 6,
    2, 33, 16, 1, 20, 27, 1, 2, 18, 27, 22, 8, 13, 27, 31, 1, 22, 3, 23, 0,
    35, 29, 2, 35, 22, 18, 20, 13, 8, 13, 3, 34, 15, 7, 5, 30, 27, 0, 14, 12,
    12, 19, 20, 30, 17, 33, 7, 2, 16, 14, 16, 7, 13, 27, 31, 9, 30, 0, 33, 7,
    21, 18, 8, 5, 13, 6, 8, 5, 22, 12, 12, 23, 7, 12,
]

MARGIN = 1.0  # module parameter from __init__; unused in forward (kept for parity)


def _contrastive_loss_kernel(cols_ref, w_ref, o_ref):
    # Per grid step (one batch tile; batch rows on the lane axis):
    #   cols_ref : (C_pad, B_TILE)  row c = output[b, clusters[c]]; clusters[0] == 0,
    #                               so row 0 is the baseline column output[:, 0].
    #   w_ref    : (C_pad, 1)       closed-form std weight per cluster (0 on pad rows),
    #                               resident across the whole grid.
    #   o_ref    : (1,     B_TILE)  loss per batch row (lane-dense store).
    cols = cols_ref[...]
    base = cols_ref[0:1, :]                 # static slice of row 0: replaces a 2nd input
    d = jnp.abs(cols - base)                # VPU
    o_ref[...] = jnp.sum(w_ref[...] * d, axis=0, keepdims=True)   # XLU sublane reduce


def _cluster_weights():
    """Static per-cluster closed-form std weights (host-side, float64)."""
    q = np.asarray(q_clusters_15subjects, dtype=np.int64)                 # (N,)
    clusters = np.asarray(sorted(set(q_clusters_15subjects)), np.int64)   # unique ids
    # The kernel reads the baseline column from row 0 of the gathered slab.
    assert clusters[0] == 0, "kernel assumes cluster id 0 exists and sorts first"
    N = int(q.shape[0])
    counts = (q[None, :] == clusters[:, None]).sum(axis=1).astype(np.float64)  # (C,)
    w = np.sqrt(counts * (N - counts) / (N * (N - 1.0)))                        # (C,)
    return clusters, w


# Max lanes per grid step.  Double-buffered f32 footprint ≈ 2 * (C_pad+1) * tile * 4 B
# ≈ 1.3 MiB at 4096 — comfortably inside v5e's 16 MiB scoped VMEM and v7x's 64 MiB.
_MAX_B_TILE = 4096


def contrastive_loss(output, margin=MARGIN):
    """output: (B, Q) float32. Returns loss of shape (B,), matching the PyTorch forward."""
    del margin  # not used in forward
    output = jnp.asarray(output, jnp.float32)
    B = int(output.shape[0])

    clusters, w = _cluster_weights()
    C = int(clusters.shape[0])
    C_pad = ((C + 7) // 8) * 8
    w_pad = np.zeros((C_pad, 1), np.float32)
    w_pad[:C, 0] = w.astype(np.float32)

    # Layout plumbing only (fuses in XLA): static column gather + transpose, pad just
    # the C_pad - C dummy cluster rows.  No zeros + dynamic-update-slice slab.
    cols_t = output[:, clusters].T                       # (C, B), batch on lanes
    if C_pad > C:
        cols_t = jnp.pad(cols_t, ((0, C_pad - C), (0, 0)))

    # Tiling.  Small B: one block equal to the full array (no (8,128) constraint, no
    # batch padding).  Large B: tile at up to _MAX_B_TILE lanes with >= 2 tiles so the
    # "parallel" batch axis splits across v7x's two TensorCores; pad only the tail.
    if B <= 512:
        b_tile, n_tiles = B, 1
    else:
        half = -(-B // 2)
        b_tile = min(_MAX_B_TILE, ((half + 127) // 128) * 128)
        n_tiles = -(-B // b_tile)
    B_pad = b_tile * n_tiles
    if B_pad > B:
        cols_t = jnp.pad(cols_t, ((0, 0), (0, B_pad - B)))   # pad columns give loss 0

    cost = pl.CostEstimate(
        flops=3 * C_pad * B_pad,                               # sub + abs + mul-add
        transcendentals=0,
        bytes_accessed=(C_pad + 1) * B_pad * 4 + C_pad * 4,
    )

    res = pl.pallas_call(
        _contrastive_loss_kernel,
        out_shape=jax.ShapeDtypeStruct((1, B_pad), jnp.float32),
        grid=(n_tiles,),
        in_specs=[
            pl.BlockSpec((C_pad, b_tile), lambda i: (0, i)),
            pl.BlockSpec((C_pad, 1), lambda i: (0, 0)),        # weights resident
        ],
        out_specs=pl.BlockSpec((1, b_tile), lambda i: (0, i)),
        compiler_params=pltpu.CompilerParams(dimension_semantics=("parallel",)),
        cost_estimate=cost,
    )(cols_t, jnp.asarray(w_pad))
    return res[0, :B]


def contrastive_loss_ref(output_np):
    """Literal re-implementation of the PyTorch forward (numpy, unbiased std)."""
    loss = 0.0
    for cluster in set(q_clusters_15subjects):
        questions = np.array(q_clusters_15subjects)
        questions = questions * np.where(questions == cluster, 1, 0)
        answers = output_np[:, questions]
        loss = loss + answers.std(axis=1, ddof=1)
    return loss


if __name__ == "__main__":
    B = 2
    Q = len(q_clusters_15subjects)   # one output column per question
    key = jax.random.PRNGKey(0)
    # "whether the question is answered correctly" -> scores in [0, 1)
    output = jax.random.uniform(key, (B, Q), dtype=jnp.float32)

    loss = jax.block_until_ready(contrastive_loss(output))

    ref = contrastive_loss_ref(np.asarray(output, dtype=np.float64))
    assert loss.shape == (B,)
    assert np.allclose(np.asarray(loss, dtype=np.float64), ref, rtol=1e-4, atol=1e-5), (loss, ref)
    print("KERNEL_OK")
</pallas_src>

<mosaic_0001>
module attributes {stable_mosaic.version = 11 : i64} {
  func.func @_contrastive_loss_kernel(%arg0: i32, %arg1: memref<40x2xf32, #tpu.memory_space<vmem>>, %arg2: memref<40x1xf32, #tpu.memory_space<vmem>>, %arg3: memref<1x2xf32, #tpu.memory_space<vmem>>) attributes {dimension_semantics = [#tpu.dimension_semantics<parallel>], iteration_bounds = array<i64: 1>, scalar_prefetch = 0 : i64, scratch_operands = 0 : i64, tpu.core_type = #tpu.core_type<tc>, window_params = [{transform_indices = @transform_0, window_bounds = array<i64: 40, 2>}, {pipeline_mode = #tpu.pipeline_mode<synchronous>, transform_indices = @transform_1, window_bounds = array<i64: 40, 1>}, {transform_indices = @transform_2, window_bounds = array<i64: 1, 2>}]} {
    %c0 = arith.constant 0 : index
    %c0_0 = arith.constant 0 : index
    %0 = vector.load %arg1[%c0, %c0_0] : memref<40x2xf32, #tpu.memory_space<vmem>>, vector<40x2xf32>
    %c0_1 = arith.constant 0 : index
    %c0_2 = arith.constant 0 : index
    %1 = vector.load %arg1[%c0_1, %c0_2] : memref<40x2xf32, #tpu.memory_space<vmem>>, vector<1x2xf32>
    %2 = vector.broadcast %1 : vector<1x2xf32> to vector<40x2xf32>
    %3 = arith.subf %0, %2 : vector<40x2xf32>
    %4 = math.absf %3 : vector<40x2xf32>
    %c0_3 = arith.constant 0 : index
    %c0_4 = arith.constant 0 : index
    %5 = vector.load %arg2[%c0_3, %c0_4] : memref<40x1xf32, #tpu.memory_space<vmem>>, vector<40x1xf32>
    %6 = vector.broadcast %5 : vector<40x1xf32> to vector<40x2xf32>
    %7 = arith.mulf %6, %4 : vector<40x2xf32>
    %cst = arith.constant dense<0.000000e+00> : vector<2xf32>
    %8 = vector.multi_reduction <add>, %7, %cst [0] : vector<40x2xf32> to vector<2xf32>
    %9 = vector.shape_cast %8 : vector<2xf32> to vector<1x2xf32>
    %c0_5 = arith.constant 0 : index
    %c0_6 = arith.constant 0 : index
    %10 = vector.load %arg3[%c0_5, %c0_6] : memref<1x2xf32, #tpu.memory_space<vmem>>, vector<1x2xf32>
    tpu.vector_store %arg3[%c0_5, %c0_6], %9 {strides = array<i32>} : memref<1x2xf32, #tpu.memory_space<vmem>>, vector<1x2xf32>,
    return
  }
  func.func @transform_0(%arg0: i32) -> (i32, i32) {
    %c0_i32 = arith.constant 0 : i32
    %c0_i32_0 = arith.constant 0 : i32
    return %c0_i32, %arg0 : i32, i32
  }
  func.func @transform_1(%arg0: i32) -> (i32, i32) {
    %c0_i32 = arith.constant 0 : i32
    %c0_i32_0 = arith.constant 0 : i32
    %c0_i32_1 = arith.constant 0 : i32
    return %c0_i32, %c0_i32_0 : i32, i32
  }
  func.func @transform_2(%arg0: i32) -> (i32, i32) {
    %c0_i32 = arith.constant 0 : i32
    %c0_i32_0 = arith.constant 0 : i32
    return %c0_i32, %arg0 : i32, i32
  }
}

</mosaic_0001>

<bundles_post_ra>
// kernel: tpu_custom_call.1
= control target key start
LH: loop header
LB: loop body
LE: loop exit
PB: predicated region body
PF: predicated region fallthrough
CT: control target
= control target key end

     0   :  { %v126_v2 = vmov 0   ;;  %s184_s0 = inlined_call_operand.vmem [shape: f32[40,2], index: 0, kind: input, shape index: {}]   ;;  %s185_s1 = inlined_call_operand.vmem [shape: f32[40,1], index: 1, kind: input, shape index: {}]   ;;  %s186_s2 = inlined_call_operand.hbm [shape: f32[1,2], index: 2, kind: output, shape index: {}]  }
   0x1   :  { %v34_v0 = vld [vmem:[%s185_s1 + $0x10] sm:$0xff]  ;;  %v32_v1 = vld [vmem:[%s185_s1] sm:$0xff]  ;;  %103 = vset.pattern.permute.xlu1 %v126_v2  ;;  %102 = vset.pattern.permute.xlu0 %v126_v2  ;;  %v35_v3 = vld [vmem:[%s185_s1 + $0x18] sm:$0xff] }
   0x2   :  { %49 = vperm.xlu1 %103, %v34_v0   ;;  %39 = vperm.xlu0 %102, %v32_v1   ;;  %v33_v4 = vld [vmem:[%s185_s1 + $0x8] sm:$0xff] }
   0x3   :  { %7 = vsyncpa [#allocation3], 0  ;;  %v36_v5 = vld [vmem:[%s185_s1 + $0x20] sm:$0xff]  ;;  %v14_v8 = vld [vmem:[%s184_s0 + $0x10] sm:$0xff]  ;;  %vm67_vm0 = vcmask 15360   ;;  %vm83_vm1 = vcmask 8192  }
   0x4   :  { %v99_v6 = vld [vmem:[%s184_s0] ss:$0 sm:$0xff]  ;;  %v13_v9 = vld [vmem:[%s184_s0 + $0x8] sm:$0xff]  ;;  %v15_v11 = vld [vmem:[%s184_s0 + $0x18] sm:$0xff] }
   0x5   :  { %v12_v7 = vld [vmem:[%s184_s0] sm:$0xff]  ;;  %v24_v12 = vsub.f32 %v14_v8, %v99_v6  ;;  %v23_v13 = vsub.f32 %v13_v9, %v99_v6  ;;  %v25_v16 = vsub.f32 %v15_v11, %v99_v6 }
   0x6   :  { %54 = vperm.xlu1 %103, %v35_v3   ;;  %44 = vperm.xlu0 %102, %v33_v4   ;;  %v22_v10 = vsub.f32 %v12_v7, %v99_v6  ;;  %v16_v14 = vld [vmem:[%s184_s0 + $0x20] sm:$0xff]  ;;  %s127_s0 = smov [#allocation2]  }
   0x7   :  { %v29_v19 = vand.u32 2147483647, %v24_v12  ;;  %v28_v20 = vand.u32 2147483647, %v23_v13  ;;  %v26_v21 = vsub.f32 %v16_v14, %v99_v6  ;;  %v30_v23 = vand.u32 2147483647, %v25_v16 }
   0x8   :  { %v27_v15 = vand.u32 2147483647, %v22_v10  ;;  %s91_s30 = sshll.u32 %s127_s0, 4  ;;  %s92_s30 = int_to_ptr.vmem [resolvable:$true] %s91_s30 }
   0x9   :  { %v31_v28 = vand.u32 2147483647, %v26_v21  ;;  %s104_s3 = scalar_lea.vmem %s92_s30, 16  ;;  %s108_s4 = scalar_lea.vmem %s92_s30, 32 }
   0xa   :  { %59 = vperm.xlu0 %102, %v36_v5   ;;  %p105_p0 = scmp.ne.s32.totalorder %s92_s30, %s104_s3  ;;  %p109_p1 = scmp.lt.s32.totalorder %s92_s30, %s92_s30 }
   0xb   :  { %p110_p2 = scmp.lt.s32.totalorder %s108_s4, %s104_s3 }
   0xd   :  { %p111_p3 = por %p110_p2, %p109_p1 }
   0xf   :  { %p112_p4 = pnand %p111_p3, %p105_p0 }
  0x7d   :  { %v50_v17 = vpop.permute.xlu1 %49  ;;  %v40_v18 = vpop.permute.xlu0 %39 }
  0x7e   :  { %v62_v22 = vmul.f32 %v40_v18, %v27_v15  ;;  %v64_v26 = vmul.f32 %v50_v17, %v29_v19 }
  0x80   :  { %v68_v29 = vsel %vm67_vm0, %v62_v22, 0.0  ;;  %v71_v34 = vsel %vm67_vm0, %v64_v26, 0.0 }
  0x81   :  { %v55_v24 = vpop.permute.xlu1 %54  ;;  %v45_v25 = vpop.permute.xlu0 %44 }
  0x82   :  { %v63_v27 = vmul.f32 %v45_v25, %v28_v20  ;;  %v65_v30 = vmul.f32 %v55_v24, %v30_v23 }
  0x84   :  { %v69_v31 = vsel %vm67_vm0, %v63_v27, 0.0  ;;  %v73_v37 = vsel %vm67_vm0, %v65_v30, 0.0 }
  0x85   :  { %v70_v32 = vadd.f32 %v69_v31, %v68_v29  ;;  %v60_v33 = vpop.permute.xlu0 %59 }
  0x86   :  { %v66_v35 = vmul.f32 %v60_v33, %v31_v28 }
  0x87   :  { %v72_v36 = vadd.f32 %v71_v34, %v70_v32 }
  0x88   :  { %v75_v39 = vsel %vm67_vm0, %v66_v35, 0.0 }
  0x89   :  { %v74_v38 = vadd.f32 %v73_v37, %v72_v36 }
  0x8b   :  { %v76_v40 = vadd.f32 %v75_v39, %v74_v38 }
  0x8d   :  { %v77_v41 = vrot.slane %v76_v40, 4 }
  0x8f   :  { %v78_v42 = vadd.f32 %v77_v41, %v76_v40 }
  0x91   :  { %v79_v43 = vrot.slane %v78_v42, 2 }
  0x93   :  { %v80_v44 = vadd.f32 %v79_v43, %v78_v42 }
  0x95   :  { %v81_v45 = vrot.slane %v80_v44, 1 }
  0x97   :  { %v82_v46 = vadd.f32 %v81_v45, %v80_v44 }
  0x99   :  { %84 = vst.msk [vmem:[#allocation2] sm:$0x1] %vm83_vm1, %v82_v46 }
  0x9a   :  { %115 = shalt.err (!%p112_p4)
}
  0x9b   :  { %94 = dma.vmem_to_hbm [thread:$0]  %s92_s30, 16, %s186_s2, [#allocation3]  }
  0x9c   :  { %124 = dma.done.wait [#allocation3], 16  }
  0x9d   :  { %125 = vsyncadd [#allocation3], 4294967280 }
  0x9e   :  { %98 = vsyncpa [#allocation3], 1 }

</bundles_post_ra>
